<compile_context>
chip_gen: v7x
topology: tpu7x:2x2x1
jax: 0.10.0
libtpu: 0.0.40
codegen_flags: <defaults>
</compile_context>

<pallas_src>
import functools

import jax
import jax.numpy as jnp
from jax.experimental import pallas as pl
from jax.experimental.pallas import tpu as pltpu


def _round_up(x, m):
    return (x + m - 1) // m * m


def _conv_same_kernel(xf_ref, w_ref, b_ref, o_ref, *, K, Wp):
    """One batch element per grid step (channels-first, flattened spatial).

    xf_ref: (1, Cin, Lin)     reflection-padded input; (Hp*Wp) flattened onto
                              the lane axis and zero-padded up to Lin (mult. of 128)
    w_ref : (K*K, Cout, Cin)  per-tap weight matrices, tap index t = kh*K + kw
    b_ref : (Cout, 1)         bias
    o_ref : (1, Cout, Lout)   output, Lout = H*Wp; columns with (m % Wp) >= W
                              are junk and are sliced off by the wrapper
    """
    _, Cout, Lout = o_ref.shape

    acc = jnp.zeros((Cout, Lout), jnp.float32)

    # Shift-and-matmul convolution: every tap is a static lane-offset slice of
    # the flattened padded image (no reshape, no im2col materialization).
    for kh in range(K):
        for kw in range(K):
            start = kh * Wp + kw                         # static lane offset
            patch = xf_ref[0, :, start:start + Lout]     # (Cin, Lout)
            acc = acc + jnp.dot(w_ref[kh * K + kw], patch,
                                preferred_element_type=jnp.float32)

    acc = acc + b_ref[...].astype(jnp.float32)           # (Cout, 1) lane-broadcast
    o_ref[0] = acc.astype(o_ref.dtype)


def conv_same_forward(x_nchw, weight_oihw, bias, kernel_size):
    """Equivalent of ConvSame.forward for dims=2.

    x_nchw      : (N, Cin, H, W)
    weight_oihw : (Cout, Cin, K, K)   (PyTorch Conv2d weight layout)
    bias        : (Cout,)
    """
    K = kernel_size
    ka = K // 2
    kb = ka - 1 if K % 2 == 0 else ka

    N, Cin, H, W = x_nchw.shape
    Cout = weight_oihw.shape[0]
    Hp, Wp = H + ka + kb, W + ka + kb

    # torch ReflectionPad2d((ka, kb, ka, kb)): pad H and W with reflection.
    x_pad = jnp.pad(x_nchw, ((0, 0), (0, 0), (ka, kb), (ka, kb)), mode="reflect")

    # Flatten spatial onto the lane axis (channels-first: no transpose needed)
    # and zero-pad the tail so every tap's shifted slice stays in bounds and the
    # input block is a whole number of 128-lane vregs.
    Lout = H * Wp
    Lin = _round_up((K - 1) * (Wp + 1) + Lout, 128)
    x_flat = x_pad.reshape(N, Cin, Hp * Wp)
    x_flat = jnp.pad(x_flat, ((0, 0), (0, 0), (0, Lin - Hp * Wp)))

    # (Cout, Cin, K, K) -> (K*K, Cout, Cin), tap-major.
    w_taps = jnp.transpose(weight_oihw, (2, 3, 0, 1)).reshape(K * K, Cout, Cin)
    b2 = bias.reshape(Cout, 1)

    itemsize = jnp.dtype(x_nchw.dtype).itemsize
    cost = pl.CostEstimate(
        flops=2 * N * H * W * K * K * Cin * Cout,
        transcendentals=0,
        bytes_accessed=(x_flat.size + w_taps.size + b2.size
                        + N * Cout * Lout) * itemsize,
    )

    out_flat = pl.pallas_call(
        functools.partial(_conv_same_kernel, K=K, Wp=Wp),
        out_shape=jax.ShapeDtypeStruct((N, Cout, Lout), x_nchw.dtype),
        grid_spec=pltpu.PrefetchScalarGridSpec(
            num_scalar_prefetch=0,
            grid=(N,),
            in_specs=[
                pl.BlockSpec((1, Cin, Lin), lambda n: (n, 0, 0)),
                pl.BlockSpec((K * K, Cout, Cin), lambda n: (0, 0, 0)),
                pl.BlockSpec((Cout, 1), lambda n: (0, 0)),
            ],
            out_specs=pl.BlockSpec((1, Cout, Lout), lambda n: (n, 0, 0)),
        ),
        compiler_params=pltpu.CompilerParams(
            dimension_semantics=("parallel",)),
        cost_estimate=cost,
    )(x_flat, w_taps, b2)

    # Free reshape + narrow slice back to NCHW (no transpose anywhere).
    return out_flat.reshape(N, Cout, H, Wp)[:, :, :, :W]


def _reference_conv_same(x_nchw, weight_oihw, bias, kernel_size):
    """Pure-JAX reference (lax conv) for correctness checking."""
    K = kernel_size
    ka = K // 2
    kb = ka - 1 if K % 2 == 0 else ka
    x_pad = jnp.pad(x_nchw, ((0, 0), (0, 0), (ka, kb), (ka, kb)), mode="reflect")
    out = jax.lax.conv_general_dilated(
        x_pad, weight_oihw, window_strides=(1, 1), padding="VALID",
        dimension_numbers=("NCHW", "OIHW", "NCHW"))
    return out + bias.reshape(1, -1, 1, 1)


if __name__ == "__main__":
    # Small shapes consistent with the module: ConvSame(in=4, out=4, k=3, dims=2)
    N, Cin, Cout, H, W, K = 2, 4, 4, 16, 16, 3

    key = jax.random.PRNGKey(0)
    kx, kw, kb_ = jax.random.split(key, 3)

    x = jax.random.normal(kx, (N, Cin, H, W), dtype=jnp.float32)
    weight = jax.random.normal(kw, (Cout, Cin, K, K), dtype=jnp.float32) * 0.1
    bias = jax.random.normal(kb_, (Cout,), dtype=jnp.float32) * 0.1

    out = conv_same_forward(x, weight, bias, K)
    out = jax.block_until_ready(out)

    ref = _reference_conv_same(x, weight, bias, K)
    assert out.shape == (N, Cout, H, W)
    assert jnp.allclose(out, ref, atol=1e-4, rtol=1e-4)

    print("KERNEL_OK")
</pallas_src>

<mosaic_0001>
module attributes {stable_mosaic.version = 11 : i64} {
  func.func @_conv_same_kernel(%arg0: i32, %arg1: memref<1x4x384xf32, #tpu.memory_space<vmem>>, %arg2: memref<9x4x4xf32, #tpu.memory_space<vmem>>, %arg3: memref<4x1xf32, #tpu.memory_space<vmem>>, %arg4: memref<1x4x288xf32, #tpu.memory_space<vmem>>) attributes {dimension_semantics = [#tpu.dimension_semantics<parallel>], iteration_bounds = array<i64: 2>, scalar_prefetch = 0 : i64, scratch_operands = 0 : i64, tpu.core_type = #tpu.core_type<tc>, window_params = [{transform_indices = @transform_0, window_bounds = array<i64: 1, 4, 384>}, {pipeline_mode = #tpu.pipeline_mode<synchronous>, transform_indices = @transform_1, window_bounds = array<i64: 9, 4, 4>}, {pipeline_mode = #tpu.pipeline_mode<synchronous>, transform_indices = @transform_2, window_bounds = array<i64: 4, 1>}, {transform_indices = @transform_3, window_bounds = array<i64: 1, 4, 288>}]} {
    %cst = arith.constant 0.000000e+00 : f32
    %0 = vector.broadcast %cst : f32 to vector<4x288xf32>
    %c0 = arith.constant 0 : index
    %c0_0 = arith.constant 0 : index
    %c0_1 = arith.constant 0 : index
    %1 = vector.load %arg1[%c0, %c0_0, %c0_1] : memref<1x4x384xf32, #tpu.memory_space<vmem>>, vector<1x4x288xf32>
    %2 = vector.shape_cast %1 : vector<1x4x288xf32> to vector<4x288xf32>
    %c0_2 = arith.constant 0 : index
    %c0_3 = arith.constant 0 : index
    %c0_4 = arith.constant 0 : index
    %3 = vector.load %arg2[%c0_2, %c0_3, %c0_4] : memref<9x4x4xf32, #tpu.memory_space<vmem>>, vector<1x4x4xf32>
    %4 = vector.shape_cast %3 : vector<1x4x4xf32> to vector<4x4xf32>
    %cst_5 = arith.constant dense<0.000000e+00> : vector<4x288xf32>
    %5 = tpu.matmul %4, %2, %cst_5 {dimension_numbers = #tpu.dot_dimension_numbers<[1], [0], [0], [1], [0, 0, 1, 1], [], []>} : vector<4x4xf32>, vector<4x288xf32>, vector<4x288xf32> -> vector<4x288xf32>
    %6 = arith.addf %0, %5 : vector<4x288xf32>
    %c0_6 = arith.constant 0 : index
    %c0_7 = arith.constant 0 : index
    %c1 = arith.constant 1 : index
    %7 = vector.load %arg1[%c0_6, %c0_7, %c1] : memref<1x4x384xf32, #tpu.memory_space<vmem>>, vector<1x4x288xf32>
    %8 = vector.shape_cast %7 : vector<1x4x288xf32> to vector<4x288xf32>
    %c1_8 = arith.constant 1 : index
    %c0_9 = arith.constant 0 : index
    %c0_10 = arith.constant 0 : index
    %9 = vector.load %arg2[%c1_8, %c0_9, %c0_10] : memref<9x4x4xf32, #tpu.memory_space<vmem>>, vector<1x4x4xf32>
    %10 = vector.shape_cast %9 : vector<1x4x4xf32> to vector<4x4xf32>
    %cst_11 = arith.constant dense<0.000000e+00> : vector<4x288xf32>
    %11 = tpu.matmul %10, %8, %cst_11 {dimension_numbers = #tpu.dot_dimension_numbers<[1], [0], [0], [1], [0, 0, 1, 1], [], []>} : vector<4x4xf32>, vector<4x288xf32>, vector<4x288xf32> -> vector<4x288xf32>
    %12 = arith.addf %6, %11 : vector<4x288xf32>
    %c0_12 = arith.constant 0 : index
    %c0_13 = arith.constant 0 : index
    %c2 = arith.constant 2 : index
    %13 = vector.load %arg1[%c0_12, %c0_13, %c2] : memref<1x4x384xf32, #tpu.memory_space<vmem>>, vector<1x4x288xf32>
    %14 = vector.shape_cast %13 : vector<1x4x288xf32> to vector<4x288xf32>
    %c2_14 = arith.constant 2 : index
    %c0_15 = arith.constant 0 : index
    %c0_16 = arith.constant 0 : index
    %15 = vector.load %arg2[%c2_14, %c0_15, %c0_16] : memref<9x4x4xf32, #tpu.memory_space<vmem>>, vector<1x4x4xf32>
    %16 = vector.shape_cast %15 : vector<1x4x4xf32> to vector<4x4xf32>
    %cst_17 = arith.constant dense<0.000000e+00> : vector<4x288xf32>
    %17 = tpu.matmul %16, %14, %cst_17 {dimension_numbers = #tpu.dot_dimension_numbers<[1], [0], [0], [1], [0, 0, 1, 1], [], []>} : vector<4x4xf32>, vector<4x288xf32>, vector<4x288xf32> -> vector<4x288xf32>
    %18 = arith.addf %12, %17 : vector<4x288xf32>
    %c0_18 = arith.constant 0 : index
    %c0_19 = arith.constant 0 : index
    %c18 = arith.constant 18 : index
    %19 = vector.load %arg1[%c0_18, %c0_19, %c18] : memref<1x4x384xf32, #tpu.memory_space<vmem>>, vector<1x4x288xf32>
    %20 = vector.shape_cast %19 : vector<1x4x288xf32> to vector<4x288xf32>
    %c3 = arith.constant 3 : index
    %c0_20 = arith.constant 0 : index
    %c0_21 = arith.constant 0 : index
    %21 = vector.load %arg2[%c3, %c0_20, %c0_21] : memref<9x4x4xf32, #tpu.memory_space<vmem>>, vector<1x4x4xf32>
    %22 = vector.shape_cast %21 : vector<1x4x4xf32> to vector<4x4xf32>
    %cst_22 = arith.constant dense<0.000000e+00> : vector<4x288xf32>
    %23 = tpu.matmul %22, %20, %cst_22 {dimension_numbers = #tpu.dot_dimension_numbers<[1], [0], [0], [1], [0, 0, 1, 1], [], []>} : vector<4x4xf32>, vector<4x288xf32>, vector<4x288xf32> -> vector<4x288xf32>
    %24 = arith.addf %18, %23 : vector<4x288xf32>
    %c0_23 = arith.constant 0 : index
    %c0_24 = arith.constant 0 : index
    %c19 = arith.constant 19 : index
    %25 = vector.load %arg1[%c0_23, %c0_24, %c19] : memref<1x4x384xf32, #tpu.memory_space<vmem>>, vector<1x4x288xf32>
    %26 = vector.shape_cast %25 : vector<1x4x288xf32> to vector<4x288xf32>
    %c4 = arith.constant 4 : index
    %c0_25 = arith.constant 0 : index
    %c0_26 = arith.constant 0 : index
    %27 = vector.load %arg2[%c4, %c0_25, %c0_26] : memref<9x4x4xf32, #tpu.memory_space<vmem>>, vector<1x4x4xf32>
    %28 = vector.shape_cast %27 : vector<1x4x4xf32> to vector<4x4xf32>
    %cst_27 = arith.constant dense<0.000000e+00> : vector<4x288xf32>
    %29 = tpu.matmul %28, %26, %cst_27 {dimension_numbers = #tpu.dot_dimension_numbers<[1], [0], [0], [1], [0, 0, 1, 1], [], []>} : vector<4x4xf32>, vector<4x288xf32>, vector<4x288xf32> -> vector<4x288xf32>
    %30 = arith.addf %24, %29 : vector<4x288xf32>
    %c0_28 = arith.constant 0 : index
    %c0_29 = arith.constant 0 : index
    %c20 = arith.constant 20 : index
    %31 = vector.load %arg1[%c0_28, %c0_29, %c20] : memref<1x4x384xf32, #tpu.memory_space<vmem>>, vector<1x4x288xf32>
    %32 = vector.shape_cast %31 : vector<1x4x288xf32> to vector<4x288xf32>
    %c5 = arith.constant 5 : index
    %c0_30 = arith.constant 0 : index
    %c0_31 = arith.constant 0 : index
    %33 = vector.load %arg2[%c5, %c0_30, %c0_31] : memref<9x4x4xf32, #tpu.memory_space<vmem>>, vector<1x4x4xf32>
    %34 = vector.shape_cast %33 : vector<1x4x4xf32> to vector<4x4xf32>
    %cst_32 = arith.constant dense<0.000000e+00> : vector<4x288xf32>
    %35 = tpu.matmul %34, %32, %cst_32 {dimension_numbers = #tpu.dot_dimension_numbers<[1], [0], [0], [1], [0, 0, 1, 1], [], []>} : vector<4x4xf32>, vector<4x288xf32>, vector<4x288xf32> -> vector<4x288xf32>
    %36 = arith.addf %30, %35 : vector<4x288xf32>
    %c0_33 = arith.constant 0 : index
    %c0_34 = arith.constant 0 : index
    %c36 = arith.constant 36 : index
    %37 = vector.load %arg1[%c0_33, %c0_34, %c36] : memref<1x4x384xf32, #tpu.memory_space<vmem>>, vector<1x4x288xf32>
    %38 = vector.shape_cast %37 : vector<1x4x288xf32> to vector<4x288xf32>
    %c6 = arith.constant 6 : index
    %c0_35 = arith.constant 0 : index
    %c0_36 = arith.constant 0 : index
    %39 = vector.load %arg2[%c6, %c0_35, %c0_36] : memref<9x4x4xf32, #tpu.memory_space<vmem>>, vector<1x4x4xf32>
    %40 = vector.shape_cast %39 : vector<1x4x4xf32> to vector<4x4xf32>
    %cst_37 = arith.constant dense<0.000000e+00> : vector<4x288xf32>
    %41 = tpu.matmul %40, %38, %cst_37 {dimension_numbers = #tpu.dot_dimension_numbers<[1], [0], [0], [1], [0, 0, 1, 1], [], []>} : vector<4x4xf32>, vector<4x288xf32>, vector<4x288xf32> -> vector<4x288xf32>
    %42 = arith.addf %36, %41 : vector<4x288xf32>
    %c0_38 = arith.constant 0 : index
    %c0_39 = arith.constant 0 : index
    %c37 = arith.constant 37 : index
    %43 = vector.load %arg1[%c0_38, %c0_39, %c37] : memref<1x4x384xf32, #tpu.memory_space<vmem>>, vector<1x4x288xf32>
    %44 = vector.shape_cast %43 : vector<1x4x288xf32> to vector<4x288xf32>
    %c7 = arith.constant 7 : index
    %c0_40 = arith.constant 0 : index
    %c0_41 = arith.constant 0 : index
    %45 = vector.load %arg2[%c7, %c0_40, %c0_41] : memref<9x4x4xf32, #tpu.memory_space<vmem>>, vector<1x4x4xf32>
    %46 = vector.shape_cast %45 : vector<1x4x4xf32> to vector<4x4xf32>
    %cst_42 = arith.constant dense<0.000000e+00> : vector<4x288xf32>
    %47 = tpu.matmul %46, %44, %cst_42 {dimension_numbers = #tpu.dot_dimension_numbers<[1], [0], [0], [1], [0, 0, 1, 1], [], []>} : vector<4x4xf32>, vector<4x288xf32>, vector<4x288xf32> -> vector<4x288xf32>
    %48 = arith.addf %42, %47 : vector<4x288xf32>
    %c0_43 = arith.constant 0 : index
    %c0_44 = arith.constant 0 : index
    %c38 = arith.constant 38 : index
    %49 = vector.load %arg1[%c0_43, %c0_44, %c38] : memref<1x4x384xf32, #tpu.memory_space<vmem>>, vector<1x4x288xf32>
    %50 = vector.shape_cast %49 : vector<1x4x288xf32> to vector<4x288xf32>
    %c8 = arith.constant 8 : index
    %c0_45 = arith.constant 0 : index
    %c0_46 = arith.constant 0 : index
    %51 = vector.load %arg2[%c8, %c0_45, %c0_46] : memref<9x4x4xf32, #tpu.memory_space<vmem>>, vector<1x4x4xf32>
    %52 = vector.shape_cast %51 : vector<1x4x4xf32> to vector<4x4xf32>
    %cst_47 = arith.constant dense<0.000000e+00> : vector<4x288xf32>
    %53 = tpu.matmul %52, %50, %cst_47 {dimension_numbers = #tpu.dot_dimension_numbers<[1], [0], [0], [1], [0, 0, 1, 1], [], []>} : vector<4x4xf32>, vector<4x288xf32>, vector<4x288xf32> -> vector<4x288xf32>
    %54 = arith.addf %48, %53 : vector<4x288xf32>
    %c0_48 = arith.constant 0 : index
    %c0_49 = arith.constant 0 : index
    %55 = vector.load %arg3[%c0_48, %c0_49] : memref<4x1xf32, #tpu.memory_space<vmem>>, vector<4x1xf32>
    %56 = vector.broadcast %55 : vector<4x1xf32> to vector<4x288xf32>
    %57 = arith.addf %54, %56 : vector<4x288xf32>
    %c0_50 = arith.constant 0 : index
    %c0_51 = arith.constant 0 : index
    %c0_52 = arith.constant 0 : index
    %58 = vector.load %arg4[%c0_50, %c0_51, %c0_52] : memref<1x4x288xf32, #tpu.memory_space<vmem>>, vector<1x4x288xf32>
    %59 = vector.shape_cast %58 : vector<1x4x288xf32> to vector<4x288xf32>
    %60 = vector.shape_cast %57 : vector<4x288xf32> to vector<1x4x288xf32>
    tpu.vector_store %arg4[%c0_50, %c0_51, %c0_52], %60 {strides = array<i32>} : memref<1x4x288xf32, #tpu.memory_space<vmem>>, vector<1x4x288xf32>,
    return
  }
  func.func @transform_0(%arg0: i32) -> (i32, i32, i32) {
    %c0_i32 = arith.constant 0 : i32
    %c0_i32_0 = arith.constant 0 : i32
    %c0_i32_1 = arith.constant 0 : i32
    return %arg0, %c0_i32, %c0_i32_0 : i32, i32, i32
  }
  func.func @transform_1(%arg0: i32) -> (i32, i32, i32) {
    %c0_i32 = arith.constant 0 : i32
    %c0_i32_0 = arith.constant 0 : i32
    %c0_i32_1 = arith.constant 0 : i32
    %c0_i32_2 = arith.constant 0 : i32
    return %c0_i32, %c0_i32_0, %c0_i32_1 : i32, i32, i32
  }
  func.func @transform_2(%arg0: i32) -> (i32, i32) {
    %c0_i32 = arith.constant 0 : i32
    %c0_i32_0 = arith.constant 0 : i32
    %c0_i32_1 = arith.constant 0 : i32
    return %c0_i32, %c0_i32_0 : i32, i32
  }
  func.func @transform_3(%arg0: i32) -> (i32, i32, i32) {
    %c0_i32 = arith.constant 0 : i32
    %c0_i32_0 = arith.constant 0 : i32
    %c0_i32_1 = arith.constant 0 : i32
    return %arg0, %c0_i32, %c0_i32_0 : i32, i32, i32
  }
}

</mosaic_0001>

<bundles_post_ra>
// kernel: tpu_custom_call.1
= control target key start
LH: loop header
LB: loop body
LE: loop exit
PB: predicated region body
PF: predicated region fallthrough
CT: control target
= control target key end

     0   :  { %8 = vsyncpa [#allocation3], 0  ;;  %s2301_s0 = inlined_call_operand.vmem [shape: f32[2,4,384], index: 0, kind: input, shape index: {}]   ;;  %s2302_s1 = inlined_call_operand.vmem [shape: f32[9,4,4], index: 1, kind: input, shape index: {}]   ;;  %s2303_s2 = inlined_call_operand.vmem [shape: f32[4,1], index: 2, kind: input, shape index: {}]   ;;  %s2304_s3 = inlined_call_operand.hbm [shape: f32[2,4,288], index: 3, kind: output, shape index: {}]  }
   0x1   :  { %10 = vsyncpa [#allocation3 + $0x1], 0  ;;  %s2052_s12 = smov 0   ;;  %s2054_s13 = smov 0  }
   0x2   :  { %s2056_s14 = smov 0   ;;  %s2058_s15 = smov 0  }
   0x3 LB: > { %s2073_s16 = sadd.s32 4294967295, %s2018_s15   ;;  %s1761_s17 = sadd.s32 4294967294, %s2018_s15   ;;  %s2018_s15 = sphi %s2058_s15, %s2310_s15   ;;  %s2014_s14 = sphi %s2056_s14, %s2309_s14   ;;  %s2010_s13 = sphi %s2054_s13, %s2308_s13   ;;  %s2006_s12 = sphi %s2052_s12, %s2307_s12  }
   0x4   : > { %s2077_s18 = sadd.s32 1, %s2018_s15   ;;  %s91_s19 = sadd.s32 1, %s2014_s14 }
   0x5   : > { %s88_s20 = ssub.s32 %s2018_s15, %s2077_s18  ;;  %p101_p0 = scmp.ne.s32.totalorder %s2014_s14, %s2010_s13 }
   0x6   : > { %p89_p1 = scmp.eq.s32.totalorder %s88_s20, 0  ;;  %p102_p2 = scmp.eq.s32.totalorder %s2073_s16, 1 }
   0x7   : > { %p107_p3 = scmp.ne.s32.totalorder %s2010_s13, %s2006_s12  ;;  %p108_p4 = scmp.eq.s32.totalorder %s1761_s17, 1 }
   0x8   : > { %s2088_s21 = scalar_select %p89_p1, %s2014_s14, %s91_s19  }
   0x9   : > { %p2090_p5 = por %p102_p2, %p101_p0  ;;  %p2094_p6 = por %p108_p4, %p107_p3 }
   0xa   : > { %p1764_p7 = scmp.ge.s32.totalorder %s2018_s15, 1  ;;  %p140_p8 = scmp.lt.s32.totalorder %s2018_s15, 3 }
   0xc   : > { %p141_p9 = pnand %p1764_p7, %p140_p8 }
   0xd   : > { %p164_p10 = scmp.lt.s32.totalorder (!%p141_p9), %s2073_s16, 1  ;;  %v2020_v0 = vmov (!%p141_p9), 0.0   ;;  %vm2021_vm0 = vmmov (!%p141_p9), 0   ;;  %s2022_s29 = smov (!%p141_p9), 127   ;;  %v1671_v11 = vld [vmem:[%s2303_s2] sm:$0xf] (!%p141_p9) }
   0xe   : > { %144 = sbr.rel (%p141_p9) target bundleno = 446 (0x1be), region = 32  ;;  %1840 = vmatprep.subr.mxu1 (!%p141_p9), %v2020_v0  ;;  %261 = vmatprep.mubr.f32.mxu0 (!%p141_p9), %v2020_v0  ;;  %s2023_s30 = smov (!%p141_p9), 126   ;;  %v2030_v12 = vmov (!%p141_p9), 0   ;;  %vm190_vm1 = vcmask (!%p141_p9), 1043456   ;;  %vm183_vm2 = vcmask (!%p141_p9), 1039360   ;;  %vm186_vm3 = vcmask (!%p141_p9), 31744  }
   0xf   : > { %1842 = vmatprep.mubr.msk.f32.mxu1 (!%p141_p9), %vm2021_vm0, %v2020_v0  ;;  %s2024_s4 = smov (!%p141_p9), 110   ;;  %s2025_s5 = smov (!%p141_p9), 109   ;;  %1954 = vset.pattern.permute.xlu0 (!%p141_p9), %v2030_v12  ;;  %v1766_v18 = vld [vmem:[%s2302_s1 + $0x4] sm:$0xf] (!%p141_p9)  ;;  %vm501_vm4 = vcmask (!%p141_p9), 1031168   ;;  %vm670_vm5 = vcmask (!%p141_p9), 900096  }
  0x10   : > { %s2026_s6 = smov (!%p141_p9), 108   ;;  %s2027_s7 = smov (!%p141_p9), 92   ;;  %v171_v24 = vld [vmem:[%s2302_s1] sm:$0xf] (!%p141_p9)  ;;  %v1777_v29 = vld [vmem:[%s2302_s1 + $0x8] sm:$0xf] (!%p141_p9) }
  0x11   : > { %s2028_s8 = smov (!%p141_p9), 91   ;;  %s2029_s9 = smov (!%p141_p9), 90   ;;  %v1783_v32 = vld [vmem:[%s2302_s1 + $0xc] sm:$0xf] (!%p141_p9)  ;;  %vm839_vm6 = vcmask (!%p141_p9), 891904   ;;  %vm1008_vm7 = vcmask (!%p141_p9), 883712  }
  0x12   : > { %v1789_v34 = vld [vmem:[%s2302_s1 + $0x10] sm:$0xf] (!%p141_p9)  ;;  %v1795_v39 = vld [vmem:[%s2302_s1 + $0x14] sm:$0xf] (!%p141_p9)  ;;  %v1801_v46 = vld [vmem:[%s2302_s1 + $0x18] sm:$0xf] (!%p141_p9) }
  0x13   : > { %vm1177_vm8 = vcmask (!%p141_p9), 752640   ;;  %v1807_v49 = vld [vmem:[%s2302_s1 + $0x1c] sm:$0xf] (!%p141_p9)  ;;  %v1813_v53 = vld [vmem:[%s2302_s1 + $0x20] sm:$0xf] (!%p141_p9)  ;;  %vm1346_vm9 = vcmask (!%p141_p9), 744448  }
  0x14   : > { %vm1515_vm10 = vcmask (!%p141_p9), 736256   ;;  %s161_s17 = sand.u32 (!%p141_p9), 1, %s2010_s13   ;;  %vm1685_vm11 = vcmask (!%p141_p9), 257024  }
  0x15   : > { %s165_s24 = scalar_select %p164_p10, %s2073_s16, 1 }
  0x16   : > { %s1901_s19 = smul.u32 12, %s161_s17 }
  0x17   : > { %s1902_s25 = smul.u32 12, %s165_s24 }
  0x18   : > { %s163_s20 = scalar_lea.vmem [#allocation2], %s1901_s19  ;;  %s1903_s24 = smul.u32 192, %s2073_s16 }
  0x19   : > { %s2107_s28 = scalar_lea.vmem %s2301_s0, %s1902_s25  ;;  %s1702_s25 = sshll.u32 %s163_s20, 4  ;;  %s2261_s25 = int_to_ptr.vmem [resolvable:$true] %s1702_s25 }
  0x1a   : > { %v2112_v1 = vld [vmem:[%s2107_s28] sm:$0xff]  ;;  %v2118_v3 = vld [vmem:[%s2107_s28 + $0x8] sm:$0xf]  ;;  %s2031_s16 = smov [#allocation2]  }
  0x1b   : > { %177 = vrot.lane.b32.xlu1 %v2112_v1, %s2022_s29  ;;  %v176_v2 = vcombine.high %v2112_v1, %v2112_v1  ;;  %v489_v4 = vld [vmem:[%s2107_s28 + $0x8] sm:$0xf] }
  0x1c   : > { %v658_v5 = vld [vmem:[%s2107_s28 + $0x8] sm:$0xf] }
  0x1d   : > { %179 = vrot.lane.b32.xlu0 %v176_v2, %s2022_s29  ;;  %v827_v6 = vld [vmem:[%s2107_s28 + $0x8] sm:$0xf] }
  0x1e   : > { %v996_v7 = vld [vmem:[%s2107_s28 + $0x8] sm:$0xf] }
  0x1f   : > { %497 = vrot.lane.b32.xlu1 %v176_v2, %s2023_s30  ;;  %v1165_v8 = vld [vmem:[%s2107_s28 + $0x8] sm:$0xf] }
  0x20   : > { %v1334_v9 = vld [vmem:[%s2107_s28 + $0x8] sm:$0xf] }
  0x21   : > { %181 = vrot.lane.b32.xlu0 %v2118_v3, %s2022_s29  ;;  %v1503_v10 = vld [vmem:[%s2107_s28 + $0x8] sm:$0xf]  ;;  %s2259_s28 = scalar_lea.hbm %s2304_s3, %s1903_s24  ;;  %s1688_s29 = scalar_lea.sflag [#allocation3], %s161_s17 }
  0x23   : > { %495 = vrot.lane.b32.xlu1 %v2112_v1, %s2023_s30 }
  0x25   : > { %499 = vrot.lane.b32.xlu0 %v489_v4, %s2023_s30  ;;  %s1956_s30 = scalar_lea.vmem %s2261_s25, 192 }
  0x26   : > { %p1957_p11 = scmp.ne.s32.totalorder %s2261_s25, %s1956_s30 }
  0x27   : > { %668 = vrot.lane.b32.xlu1 %v658_v5, %s2024_s4 }
  0x28   : > { %p1958_p12 = pnand %p1957_p11, %p2090_p5 }
  0x29   : > { %666 = vrot.lane.b32.xlu0 %v176_v2, %s2024_s4 }
  0x2a   : > { %p1959_p13 = pneg %p1958_p12 }
  0x2b   : > { %835 = vrot.lane.b32.xlu1 %v176_v2, %s2025_s5 }
  0x2d   : > { %664 = vrot.lane.b32.xlu0 %v2112_v1, %s2024_s4  ;;  %s1960_s4 = sshll.u32 %s2031_s16, 4  ;;  %s1961_s4 = int_to_ptr.vmem [resolvable:$false] %s1960_s4 }
  0x2e   : > { %p1963_p0 = scmp.lt.s32.totalorder %s2261_s25, %s1961_s4 }
  0x2f   : > { %833 = vrot.lane.b32.xlu1 %v2112_v1, %s2025_s5 }
  0x31   : > { %837 = vrot.lane.b32.xlu0 %v827_v6, %s2025_s5  ;;  %s1962_s5 = scalar_lea.vmem %s1961_s4, 384 }
  0x32   : > { %p1964_p1 = scmp.lt.s32.totalorder %s1962_s5, %s1956_s30 }
  0x33   : > { %1006 = vrot.lane.b32.xlu1 %v996_v7, %s2026_s6 }
  0x34   : > { %p1965_p2 = por %p1964_p1, %p1963_p0 }
  0x35   : > { %1004 = vrot.lane.b32.xlu0 %v176_v2, %s2026_s6 }
  0x36   : > { %p1966_p3 = pnand %p1965_p2, %p1959_p13 }
  0x37   : > { %1173 = vrot.lane.b32.xlu1 %v176_v2, %s2027_s7 }
  0x39   : > { %1002 = vrot.lane.b32.xlu0 %v2112_v1, %s2026_s6 }
  0x3b   : > { %1171 = vrot.lane.b32.xlu1 %v2112_v1, %s2027_s7 }
  0x3d   : > { %1175 = vrot.lane.b32.xlu0 %v1165_v8, %s2027_s7 }
  0x3f   : > { %1344 = vrot.lane.b32.xlu1 %v1334_v9, %s2028_s8 }
  0x41   : > { %1342 = vrot.lane.b32.xlu0 %v176_v2, %s2028_s8 }
  0x43   : > { %1511 = vrot.lane.b32.xlu1 %v176_v2, %s2029_s9 }
  0x45   : > { %1340 = vrot.lane.b32.xlu0 %v2112_v1, %s2028_s8 }
  0x47   : > { %1509 = vrot.lane.b32.xlu1 %v2112_v1, %s2029_s9 }
  0x49   : > { %1513 = vrot.lane.b32.xlu0 %v1503_v10, %s2029_s9 }
  0x4d   : > { %1674 = vperm.xlu0 %1954, %v1671_v11  }
  0x8d   : > { %v178_v13 = vpop.permute.xlu1 %177 }
  0x8f   : > { %v180_v14 = vpop.permute.xlu0 %179 }
  0x90   : > { %v184_v19 = vsel %vm183_vm2, %v178_v13, %v180_v14 }
  0x91   : > { %v498_v15 = vpop.permute.xlu1 %497 }
  0x93   : > { %v182_v16 = vpop.permute.xlu0 %181 }
  0x94   : > { %1841 = vmatpush3.msk.msra.mxu1 %vm190_vm1, %v182_v16  ;;  %v185_v17 = vsel %vm183_vm2, %v180_v14, %v182_v16 }
  0x95   : > { %1767 = vmatprep.subr.msk.mxu0 %vm190_vm1, %v185_v17  ;;  %v496_v20 = vpop.permute.xlu1 %495  ;;  %1843 = vmatmul.mubr.msk.f32.vlgmr.msra.gmra.mrb[0].mxu1 %vm186_vm3, %v1766_v18 }
  0x96   : > { %1768 = vmatpush1.msk.msra.mxu0 %vm190_vm1, %v184_v19  ;;  %1845 = vmatprep.subr.mxu1 %v2020_v0  ;;  %v502_v26 = vsel %vm501_vm4, %v496_v20, %v498_v15 }
  0x97   : > { %1769 = vmatmul.mubr.msk.f32.vlgmr.msra.gmra.mrb[0].mxu0 %vm186_vm3, %v1766_v18  ;;  %1772 = vmatprep.subr.msk.mxu0 %vm190_vm1, %v176_v2  ;;  %v500_v21 = vpop.permute.xlu0 %499 }
  0x98   : > { %1773 = vmatpush1.msk.msra.mxu0 %vm190_vm1, %v2112_v1  ;;  %v503_v22 = vsel %vm501_vm4, %v498_v15, %v500_v21  ;;  %1846 = vmatpush3.msk.msra.mxu1 %vm190_vm1, %v2118_v3 }
  0x99   : > { %1778 = vmatprep.subr.msk.mxu0 %vm190_vm1, %v503_v22  ;;  %1847 = vmatprep.mubr.msk.f32.mxu1 %vm2021_vm0, %v2020_v0  ;;  %v669_v23 = vpop.permute.xlu1 %668 }
  0x9a   : > { %1850 = vmatprep.subr.mxu1 %v2020_v0  ;;  %411 = vmatprep.mubr.f32.mxu0 %v2020_v0 }
  0x9b   : > { %1848 = vmatmul.mubr.msk.f32.vlgmr.msra.gmra.mrb[2].mxu1 %vm186_vm3, %v171_v24  ;;  %v667_v25 = vpop.permute.xlu0 %666 }
  0x9c   : > { %1851 = vmatpush3.msk.msra.mxu1 %vm190_vm1, %v500_v21  ;;  %1852 = vmatprep.mubr.msk.f32.mxu1 %vm2021_vm0, %v2020_v0  ;;  %v672_v28 = vsel %vm670_vm5, %v667_v25, %v669_v23 }
  0x9d   : > { %1855 = vmatprep.subr.mxu1 %v2020_v0  ;;  %v836_v27 = vpop.permute.xlu1 %835 }
  0x9f   : > { %1774 = vmatmul.mubr.msk.f32.vlgmr.msra.gmra.mrb[0].mxu0 %vm186_vm3, %v171_v24  ;;  %v665_v30 = vpop.permute.xlu0 %664  ;;  %1853 = vmatmul.mubr.msk.f32.vlgmr.msra.gmra.mrb[4].mxu1 %vm186_vm3, %v1777_v29 }
  0xa0   : > { %1779 = vmatpush1.msk.msra.mxu0 %vm190_vm1, %v502_v26  ;;  %577 = vmatprep.mubr.f32.mxu0 %v2020_v0  ;;  %v671_v35 = vsel %vm670_vm5, %v665_v30, %v667_v25 }
  0xa1   : > { %1784 = vmatprep.subr.msk.mxu0 %vm190_vm1, %v672_v28  ;;  %1856 = vmatpush3.msk.msra.mxu1 %vm190_vm1, %v669_v23  ;;  %v834_v31 = vpop.permute.xlu1 %833 }
  0xa2   : > { %1857 = vmatprep.mubr.msk.f32.mxu1 %vm2021_vm0, %v2020_v0  ;;  %1860 = vmatprep.subr.mxu1 %v2020_v0  ;;  %v840_v42 = vsel %vm839_vm6, %v834_v31, %v836_v27 }
  0xa3   : > { %v838_v33 = vpop.permute.xlu0 %837  ;;  %1858 = vmatmul.mubr.msk.f32.vlgmr.msra.gmra.mrb[6].mxu1 %vm186_vm3, %v1783_v32 }
  0xa4   : > { %1861 = vmatpush3.msk.msra.mxu1 %vm190_vm1, %v838_v33  ;;  %1862 = vmatprep.mubr.msk.f32.mxu1 %vm2021_vm0, %v2020_v0  ;;  %v841_v37 = vsel %vm839_vm6, %v836_v27, %v838_v33 }
  0xa5   : > { %v1007_v36 = vpop.permute.xlu1 %1006  ;;  %1865 = vmatprep.subr.mxu1 %v2020_v0 }
  0xa7   : > { %1780 = vmatmul.mubr.msk.f32.vlgmr.msra.gmra.mrb[0].mxu0 %vm186_vm3, %v1777_v29  ;;  %v1005_v38 = vpop.permute.xlu0 %1004  ;;  %1863 = vmatmul.mubr.msk.f32.vlgmr.msra.gmra.mrb[8].mxu1 %vm186_vm3, %v1789_v34 }
  0xa8   : > { %1785 = vmatpush1.msk.msra.mxu0 %vm190_vm1, %v671_v35  ;;  %746 = vmatprep.mubr.f32.mxu0 %v2020_v0  ;;  %v1010_v44 = vsel %vm1008_vm7, %v1005_v38, %v1007_v36 }
  0xa9   : > { %1790 = vmatprep.subr.msk.mxu0 %vm190_vm1, %v841_v37  ;;  %v1174_v40 = vpop.permute.xlu1 %1173  ;;  %1866 = vmatpush3.msk.msra.mxu1 %vm190_vm1, %v1007_v36 }
  0xaa   : > { %1867 = vmatprep.mubr.msk.f32.mxu1 %vm2021_vm0, %v2020_v0  ;;  %1870 = vmatprep.subr.mxu1 %v2020_v0 }
  0xab   : > { %v1003_v41 = vpop.permute.xlu0 %1002  ;;  %1868 = vmatmul.mubr.msk.f32.vlgmr.msra.gmra.mrb[10].mxu1 %vm186_vm3, %v1795_v39 }
  0xac   : > { %1872 = vmatprep.mubr.msk.f32.mxu1 %vm2021_vm0, %v2020_v0  ;;  %v1009_v50 = vsel %vm1008_vm7, %v1003_v41, %v1005_v38 }
  0xad   : > { %v1172_v43 = vpop.permute.xlu1 %1171 }
  0xae   : > { %v1178_v55 = vsel %vm1177_vm8, %v1172_v43, %v1174_v40 }
  0xaf   : > { %1786 = vmatmul.mubr.msk.f32.vlgmr.msra.gmra.mrb[0].mxu0 %vm186_vm3, %v1783_v32  ;;  %v1176_v45 = vpop.permute.xlu0 %1175 }
  0xb0   : > { %1791 = vmatpush1.msk.msra.mxu0 %vm190_vm1, %v840_v42  ;;  %915 = vmatprep.mubr.f32.mxu0 %v2020_v0  ;;  %v1179_v51 = vsel %vm1177_vm8, %v1174_v40, %v1176_v45 }
  0xb1   : > { %1796 = vmatprep.subr.msk.mxu0 %vm190_vm1, %v1010_v44  ;;  %1871 = vmatpush3.msk.msra.mxu1 %vm190_vm1, %v1176_v45  ;;  %v1345_v47 = vpop.permute.xlu1 %1344 }
  0xb2   : > { %1873 = vmatmul.mubr.msk.f32.vlgmr.msra.gmra.mrb[12].mxu1 %vm186_vm3, %v1801_v46  ;;  %1875 = vmatprep.subr.mxu1 %v2020_v0 }
  0xb3   : > { %v1343_v48 = vpop.permute.xlu0 %1342  ;;  %1876 = vmatpush3.msk.msra.mxu1 %vm190_vm1, %v1345_v47  ;;  %1877 = vmatprep.mubr.msk.f32.mxu1 %vm2021_vm0, %v2020_v0 }
  0xb4   : > { %1880 = vmatprep.subr.mxu1 %v2020_v0  ;;  %v1348_v56 = vsel %vm1346_vm9, %v1343_v48, %v1345_v47 }
  0xb5   : > { %v1512_v57 = vpop.permute.xlu1 %1511 }
  0xb6   : > { %1878 = vmatmul.mubr.msk.f32.vlgmr.msra.gmra.mrb[14].mxu1 %vm186_vm3, %v1807_v49 }
  0xb7   : > { %1792 = vmatmul.mubr.msk.f32.vlgmr.msra.gmra.mrb[0].mxu0 %vm186_vm3, %v1789_v34  ;;  %v1341_v52 = vpop.permute.xlu0 %1340  ;;  %1882 = vmatprep.mubr.msk.f32.mxu1 %vm2021_vm0, %v2020_v0 }
  0xb8   : > { %1797 = vmatpush1.msk.msra.mxu0 %vm190_vm1, %v1009_v50  ;;  %1084 = vmatprep.mubr.f32.mxu0 %v2020_v0  ;;  %v1347_v58 = vsel %vm1346_vm9, %v1341_v52, %v1343_v48 }
  0xb9   : > { %1802 = vmatprep.subr.msk.mxu0 %vm190_vm1, %v1179_v51  ;;  %v1510_v60 = vpop.permute.xlu1 %1509 }
  0xba   : > { %v1516_v61 = vsel %vm1515_vm10, %v1510_v60, %v1512_v57 }
  0xbb   : > { %v1514_v54 = vpop.permute.xlu0 %1513 }
  0xbc   : > { %1881 = vmatpush3.msk.msra.mxu1 %vm190_vm1, %v1514_v54  ;;  %v1517_v59 = vsel %vm1515_vm10, %v1512_v57, %v1514_v54 }
  0xbd   : > { %1883 = vmatmul.mubr.msk.f32.vlgmr.msra.gmra.mrb[16].mxu1 %vm186_vm3, %v1813_v53 }
  0xbf   : > { %1798 = vmatmul.mubr.msk.f32.vlgmr.msra.gmra.mrb[0].mxu0 %vm186_vm3, %v1795_v39 }
  0xc0   : > { %1803 = vmatpush1.msk.msra.mxu0 %vm190_vm1, %v1178_v55  ;;  %1253 = vmatprep.mubr.f32.mxu0 %v2020_v0 }
  0xc1   : > { %1808 = vmatprep.subr.msk.mxu0 %vm190_vm1, %v1348_v56 }
  0xc7   : > { %1804 = vmatmul.mubr.msk.f32.vlgmr.msra.gmra.mrb[0].mxu0 %vm186_vm3, %v1801_v46 }
  0xc8   : > { %1809 = vmatpush1.msk.msra.mxu0 %vm190_vm1, %v1347_v58  ;;  %1422 = vmatprep.mubr.f32.mxu0 %v2020_v0 }
  0xc9   : > { %1814 = vmatprep.subr.msk.mxu0 %vm190_vm1, %v1517_v59 }
  0xcc   : > { %v1675_v22 = vpop.permute.xlu0 %1674 }
  0xcf   : > { %1810 = vmatmul.mubr.msk.f32.vlgmr.msra.gmra.mrb[0].mxu0 %vm186_vm3, %v1807_v49 }
  0xd0   : > { %1815 = vmatpush1.msk.msra.mxu0 %vm190_vm1, %v1516_v61  ;;  %1591 = vmatprep.mubr.f32.mxu0 %v2020_v0 }
  0xd7   : > { %1816 = vmatmul.mubr.msk.f32.vlgmr.msra.gmra.mrb[0].mxu0 %vm186_vm3, %v1813_v53 }
 0x168   : > { %v334_v62 = vpop.f32.mrb[0].mxu1 }
 0x169   : > { %v1844_v63 = vpop.f32.mrb[1].mxu1 }
 0x16e   : > { %v484_v1 = vpop.f32.mrb[2].mxu1 }
 0x16f   : > { %v485_v2 = vadd.f32 %v484_v1, %v334_v62  ;;  %v1849_v3 = vpop.f32.mrb[3].mxu1 }
 0x172   : > { %v650_v4 = vpop.f32.mrb[4].mxu1 }
 0x173   : > { %v656_v5 = vadd.f32 %v650_v4, %v485_v2  ;;  %v1854_v6 = vpop.f32.mrb[5].mxu1 }
 0x176   : > { %v819_v7 = vpop.f32.mrb[6].mxu1 }
 0x177   : > { %v825_v8 = vadd.f32 %v819_v7, %v656_v5  ;;  %v1859_v9 = vpop.f32.mrb[7].mxu1 }
 0x17a   : > { %v988_v10 = vpop.f32.mrb[8].mxu1 }
 0x17b   : > { %v994_v11 = vadd.f32 %v988_v10, %v825_v8  ;;  %v1864_v12 = vpop.f32.mrb[9].mxu1 }
 0x17e   : > { %v1157_v13 = vpop.f32.mrb[10].mxu1 }
 0x17f   : > { %v1163_v14 = vadd.f32 %v1157_v13, %v994_v11  ;;  %v1869_v0 = vpop.f32.mrb[11].mxu1 }
 0x185   : > { %v1326_v15 = vpop.f32.mrb[12].mxu1 }
 0x186   : > { %v1332_v16 = vadd.f32 %v1326_v15, %v1163_v14  ;;  %v1874_v17 = vpop.f32.mrb[13].mxu1 }
 0x189   : > { %v1495_v18 = vpop.f32.mrb[14].mxu1 }
 0x18a   : > { %v1501_v19 = vadd.f32 %v1495_v18, %v1332_v16  ;;  %v1879_v20 = vpop.f32.mrb[15].mxu1 }
 0x190   : > { %v1664_v21 = vpop.f32.mrb[16].mxu1 }
 0x191   : > { %v1670_v23 = vadd.f32 %v1664_v21, %v1501_v19  ;;  %v1884_v24 = vpop.f32.mrb[17].mxu1 }
 0x193   : > { %v1679_v25 = vadd.f32 %v1675_v22, %v1670_v23 }
 0x195   : > { %1686 = vst.msk [vmem:[%s163_s20 + $0x8] sm:$0xf] %vm1685_vm11, %v1679_v25 }
 0x1aa   : > { %v1593_v26 = vpop.f32.mrb[0].mxu0 }
 0x1ab   : > { %v1677_v27 = vadd.f32 %v1675_v22, %v1593_v26  ;;  %v1595_v28 = vpop.f32.mrb[1].mxu0 }
 0x1ac   : > { %v1678_v29 = vadd.f32 %v1675_v22, %v1595_v28 }
 0x1ae   : > { %v1682_v30 = vcombine.low %v1677_v27, %v1678_v29 }
 0x1b0   : > { %1684 = vst [vmem:[%s163_s20] sm:$0xff] %v1682_v30 }
 0x1b1   : > { %1969 = shalt.err (!%p1966_p3)
}
 0x1b2   : > { %s1970_s6 = scalar_lea.hbm %s2259_s28, 192  ;;  %s1974_s9 = scalar_lea.hbm %s2304_s3, 384 }
 0x1b3   : > { %p1971_p4 = scmp.ne.s32.totalorder %s2259_s28, %s1970_s6  ;;  %p1975_p9 = scmp.lt.u32.totalorder %s2259_s28, %s2304_s3 }
 0x1b4   : > { %p1976_p10 = scmp.lt.u32.totalorder %s1974_s9, %s1970_s6  ;;  %p1978_p12 = scmp.lt.u32.totalorder %s1970_s6, %s2259_s28 }
 0x1b5   : > { %p1972_p7 = pnand %p1971_p4, %p2090_p5 }
 0x1b6   : > { %p1977_p11 = por %p1976_p10, %p1975_p9 }
 0x1b7   : > { %p1973_p8 = pneg %p1972_p7 }
 0x1b8   : > { %p1979_p13 = por %p1978_p12, %p1977_p11 }
 0x1ba   : > { %p1980_p0 = pnand %p1979_p13, %p1973_p8 }
 0x1bc   : > { %1983 = shalt.err (!%p1980_p0)
}
 0x1bd   : > { %1904 = dma.vmem_to_hbm [thread:$0]  (%p2090_p5), %s2261_s25, 192, %s2259_s28, %s1688_s29  }
 0x1be PF: > { %p1910_p1 = scmp.ge.s32.totalorder %s2018_s15, 2  ;;  %s1714_s17 = sand.u32 1, %s2006_s12  }
 0x1bf   : > { %s1715_s19 = scalar_lea.sflag [#allocation3], %s1714_s17 }
 0x1c0   : > { %p1907_p2 = pnand %p1910_p1, %p2094_p6 }
 0x1c2   : > { %2001 = dma.done.wait (!%p1907_p2), %s1715_s19, 192  }
 0x1c3   : > { %2003 = vsyncadd (!%p1907_p2), %s1715_s19, 4294967104  ;;  %p13_p3 = scmp.ge.s32.totalorder %s2077_s18, 4   ;;  %s2307_s12 = smov %s2010_s13 }
 0x1c4   : > { %s2308_s13 = smov %s2014_s14  ;;  %s2309_s14 = smov %s2088_s21 }
 0x1c5   : > { %s2310_s15 = smov %s2077_s18  ;;  %15 = sbr.rel (!%p13_p3) target bundleno = 3 (0x3), region = 75 }
 0x1cc   :  { %1720 = vsyncpa [#allocation3], 1 }
 0x1cd   :  { %1722 = vsyncpa [#allocation3 + $0x1], 1 }

</bundles_post_ra>
